<compile_context>
chip_gen: v7x
topology: tpu7x:2x2x1
jax: 0.10.0
libtpu: 0.0.40
codegen_flags: <defaults>
</compile_context>

<pallas_src>
import functools

import jax
import jax.numpy as jnp
from jax import lax
from jax.experimental import pallas as pl
from jax.experimental.pallas import tpu as pltpu

LANES = 128   # vreg lane width
CHUNK = 8     # sublane rows per inner chunk -> acc/pre are exactly one f32 vreg


def _default_tanh_dtype():
    """bf16 tanh on chips with a bf16 EUP (v6e / v7x); f32 elsewhere (v5e)."""
    try:
        kind = jax.devices()[0].device_kind.lower()
    except Exception:  # pragma: no cover - be conservative
        return jnp.float32
    if ("v6" in kind) or ("v7" in kind) or ("7x" in kind):
        return jnp.bfloat16
    return jnp.float32


def mlp_kernel(x_ref, w1_ref, b1_ref, w2_ref, b2_ref, o_ref, *, tanh_dtype):
    """One lane-dense batch tile of the 2-layer MLP.

    x_ref : VMEM (n_dim, TR, 128)  batch flattened onto sublanes x lanes
    w1_ref: SMEM (n_dim, H)        fc1 weight (transposed vs. PyTorch layout)
    b1_ref: SMEM (H,)              fc1 bias
    w2_ref: SMEM (H,)              fc2 weight (flattened)
    b2_ref: SMEM (1,)              fc2 bias
    o_ref : VMEM (TR, 128)         y for the same batch tile

    y = b2 + sum_j w2[j] * tanh(b1[j] + sum_k w1[k, j] * x_k)
    Pure VPU mul/add + EUP tanh (MXU is degenerate for K=n_dim, N=1).
    """
    n_dim, tr, lanes = x_ref.shape
    hidden = b1_ref.shape[0]
    n_chunks = tr // CHUNK

    # Hoist all SMEM scalar reads out of the loops (loop-invariant).
    w1 = [[w1_ref[k, j] for j in range(hidden)] for k in range(n_dim)]
    b1 = [b1_ref[j] for j in range(hidden)]
    w2 = [w2_ref[j] for j in range(hidden)]
    b2 = b2_ref[0]

    def chunk_body(c, carry):
        row = pl.multiple_of(c * CHUNK, CHUNK)
        # Hoist x loads out of the hidden-unit loop: n_dim loads per chunk.
        xs = [x_ref[k, pl.ds(row, CHUNK), :] for k in range(n_dim)]
        acc = jnp.zeros((CHUNK, lanes), jnp.float32)
        for j in range(hidden):
            pre = xs[0] * w1[0][j] + b1[j]
            for k in range(1, n_dim):
                pre = pre + xs[k] * w1[k][j]
            t = jnp.tanh(pre.astype(tanh_dtype)).astype(jnp.float32)
            acc = acc + t * w2[j]
        o_ref[pl.ds(row, CHUNK), :] = (acc + b2).astype(o_ref.dtype)
        return carry

    lax.fori_loop(0, n_chunks, chunk_body, 0)


def mlp_forward(x, w1, b1, w2, b2, *, block_rows=None, tanh_dtype=None):
    """x: (B, n_dim); w1: (n_dim, H); b1: (H,); w2: (H,); b2: (1,) -> (B, 1).

    Note: w1 is the transpose of PyTorch's nn.Linear.weight (H, n_dim).
    """
    B, n_dim = x.shape
    hidden = b1.shape[0]
    if tanh_dtype is None:
        tanh_dtype = _default_tanh_dtype()

    n_rows = -(-B // LANES)  # ceil(B / 128) sublane-rows of 128 batch lanes
    if block_rows is None:
        # Big tiles to amortize the ~0.35us/step pipeline cost (up to 512 rows
        # = 64K batch elems, ~1-2 MiB double-buffered), but keep >=2 grid steps
        # when the batch allows it so both v7x TensorCores get work.
        block_rows = min(512, -(-n_rows // 8) * 8)
        if n_rows > 8:
            half = -(-((n_rows + 1) // 2) // 8) * 8
            block_rows = max(8, min(block_rows, half))
    assert block_rows % 8 == 0 and block_rows >= 8

    n_rows_pad = -(-n_rows // block_rows) * block_rows
    B_pad = n_rows_pad * LANES

    # Wrapper-side re-layout (layout plumbing, not compute): batch goes onto
    # (sublane, lane) so every in-kernel load/tanh/store is lane-dense.
    xp = jnp.pad(x, ((0, B_pad - B), (0, 0)))
    if n_dim == 1:
        xt = xp.reshape(1, n_rows_pad, LANES)        # no transpose pass
    else:
        xt = xp.T.reshape(n_dim, n_rows_pad, LANES)

    grid = (n_rows_pad // block_rows,)
    kernel = functools.partial(mlp_kernel, tanh_dtype=tanh_dtype)

    itemsize = jnp.dtype(x.dtype).itemsize
    cost = pl.CostEstimate(
        flops=B_pad * hidden * (2 * n_dim + 2),
        transcendentals=B_pad * hidden,
        bytes_accessed=B_pad * (n_dim + 1) * itemsize,
    )

    out = pl.pallas_call(
        kernel,
        out_shape=jax.ShapeDtypeStruct((n_rows_pad, LANES), x.dtype),
        grid=grid,
        in_specs=[
            pl.BlockSpec((n_dim, block_rows, LANES), lambda i: (0, i, 0)),
            pl.BlockSpec(memory_space=pltpu.MemorySpace.SMEM),  # w1
            pl.BlockSpec(memory_space=pltpu.MemorySpace.SMEM),  # b1
            pl.BlockSpec(memory_space=pltpu.MemorySpace.SMEM),  # w2
            pl.BlockSpec(memory_space=pltpu.MemorySpace.SMEM),  # b2
        ],
        out_specs=pl.BlockSpec((block_rows, LANES), lambda i: (i, 0)),
        compiler_params=pltpu.CompilerParams(
            dimension_semantics=("parallel",)),
        cost_estimate=cost,
    )(xt, w1, b1, w2, b2)

    return out.reshape(B_pad, 1)[:B]


def init_params(key, n_dim=1, hidden_dim=32, dtype=jnp.float32):
    # Deterministic init mimicking nn.Linear's U(-1/sqrt(fan_in), 1/sqrt(fan_in)).
    k1, k2, k3, k4 = jax.random.split(key, 4)
    bound1 = 1.0 / float(max(n_dim, 1)) ** 0.5
    bound2 = 1.0 / float(hidden_dim) ** 0.5
    w1 = jax.random.uniform(k1, (n_dim, hidden_dim), dtype, -bound1, bound1)
    b1 = jax.random.uniform(k2, (hidden_dim,), dtype, -bound1, bound1)
    w2 = jax.random.uniform(k3, (hidden_dim,), dtype, -bound2, bound2)
    b2 = jax.random.uniform(k4, (1,), dtype, -bound2, bound2)
    return w1, b1, w2, b2


if __name__ == "__main__":
    key = jax.random.PRNGKey(0)
    kx, kp, kx2 = jax.random.split(key, 3)

    n_dim, hidden_dim = 1, 32
    w1, b1, w2, b2 = init_params(kp, n_dim=n_dim, hidden_dim=hidden_dim)

    def ref_fn(x):
        # Same math as the PyTorch module (element-wise reference).
        h = jnp.tanh(x @ w1 + b1[None, :])
        return jnp.sum(h * w2[None, :], axis=-1, keepdims=True) + b2[0]

    # Tolerance depends on whether the bf16-tanh path is active (v6e/v7x).
    if _default_tanh_dtype() == jnp.bfloat16:
        atol = rtol = 2e-2
    else:
        atol = rtol = 1e-4

    # Small batch (single lane-dense tile, grid of 1 step).
    x_small = jax.random.normal(kx, (8, n_dim), jnp.float32)
    out_small = mlp_forward(x_small, w1, b1, w2, b2)
    jax.block_until_ready(out_small)
    assert out_small.shape == (8, 1)
    assert jnp.allclose(out_small, ref_fn(x_small), atol=atol, rtol=rtol)

    # Larger, non-aligned batch. Default heuristic -> 2-step pipelined grid
    # with a padded remainder tile; explicit block_rows=8 -> 3-step grid.
    x_big = jax.random.normal(kx2, (3000, n_dim), jnp.float32)
    out_big = mlp_forward(x_big, w1, b1, w2, b2)
    jax.block_until_ready(out_big)
    assert out_big.shape == (3000, 1)
    assert jnp.allclose(out_big, ref_fn(x_big), atol=atol, rtol=rtol)

    out_big8 = mlp_forward(x_big, w1, b1, w2, b2, block_rows=8)
    jax.block_until_ready(out_big8)
    assert jnp.allclose(out_big8, ref_fn(x_big), atol=atol, rtol=rtol)

    print("KERNEL_OK")
</pallas_src>

<mosaic_0001>
module attributes {stable_mosaic.version = 11 : i64} {
  func.func @mlp_kernel(%arg0: i32, %arg1: memref<1x8x128xf32, #tpu.memory_space<vmem>>, %arg2: memref<1x32xf32, #tpu.memory_space<smem>>, %arg3: memref<32xf32, #tpu.memory_space<smem>>, %arg4: memref<32xf32, #tpu.memory_space<smem>>, %arg5: memref<1xf32, #tpu.memory_space<smem>>, %arg6: memref<8x128xf32, #tpu.memory_space<vmem>>) attributes {dimension_semantics = [#tpu.dimension_semantics<parallel>], iteration_bounds = array<i64: 1>, scalar_prefetch = 0 : i64, scratch_operands = 0 : i64, tpu.core_type = #tpu.core_type<tc>, window_params = [{transform_indices = @transform_0, window_bounds = array<i64: 1, 8, 128>}, {transform_indices = @transform_1, window_bounds = array<i64: 1, 32>}, {transform_indices = @transform_2, window_bounds = array<i64: 32>}, {transform_indices = @transform_3, window_bounds = array<i64: 32>}, {transform_indices = @transform_4, window_bounds = array<i64: 1>}, {transform_indices = @transform_5, window_bounds = array<i64: 8, 128>}]} {
    %c0 = arith.constant 0 : index
    %c0_0 = arith.constant 0 : index
    %0 = memref.load %arg2[%c0, %c0_0] : memref<1x32xf32, #tpu.memory_space<smem>>
    %c0_1 = arith.constant 0 : index
    %c1 = arith.constant 1 : index
    %1 = memref.load %arg2[%c0_1, %c1] : memref<1x32xf32, #tpu.memory_space<smem>>
    %c0_2 = arith.constant 0 : index
    %c2 = arith.constant 2 : index
    %2 = memref.load %arg2[%c0_2, %c2] : memref<1x32xf32, #tpu.memory_space<smem>>
    %c0_3 = arith.constant 0 : index
    %c3 = arith.constant 3 : index
    %3 = memref.load %arg2[%c0_3, %c3] : memref<1x32xf32, #tpu.memory_space<smem>>
    %c0_4 = arith.constant 0 : index
    %c4 = arith.constant 4 : index
    %4 = memref.load %arg2[%c0_4, %c4] : memref<1x32xf32, #tpu.memory_space<smem>>
    %c0_5 = arith.constant 0 : index
    %c5 = arith.constant 5 : index
    %5 = memref.load %arg2[%c0_5, %c5] : memref<1x32xf32, #tpu.memory_space<smem>>
    %c0_6 = arith.constant 0 : index
    %c6 = arith.constant 6 : index
    %6 = memref.load %arg2[%c0_6, %c6] : memref<1x32xf32, #tpu.memory_space<smem>>
    %c0_7 = arith.constant 0 : index
    %c7 = arith.constant 7 : index
    %7 = memref.load %arg2[%c0_7, %c7] : memref<1x32xf32, #tpu.memory_space<smem>>
    %c0_8 = arith.constant 0 : index
    %c8 = arith.constant 8 : index
    %8 = memref.load %arg2[%c0_8, %c8] : memref<1x32xf32, #tpu.memory_space<smem>>
    %c0_9 = arith.constant 0 : index
    %c9 = arith.constant 9 : index
    %9 = memref.load %arg2[%c0_9, %c9] : memref<1x32xf32, #tpu.memory_space<smem>>
    %c0_10 = arith.constant 0 : index
    %c10 = arith.constant 10 : index
    %10 = memref.load %arg2[%c0_10, %c10] : memref<1x32xf32, #tpu.memory_space<smem>>
    %c0_11 = arith.constant 0 : index
    %c11 = arith.constant 11 : index
    %11 = memref.load %arg2[%c0_11, %c11] : memref<1x32xf32, #tpu.memory_space<smem>>
    %c0_12 = arith.constant 0 : index
    %c12 = arith.constant 12 : index
    %12 = memref.load %arg2[%c0_12, %c12] : memref<1x32xf32, #tpu.memory_space<smem>>
    %c0_13 = arith.constant 0 : index
    %c13 = arith.constant 13 : index
    %13 = memref.load %arg2[%c0_13, %c13] : memref<1x32xf32, #tpu.memory_space<smem>>
    %c0_14 = arith.constant 0 : index
    %c14 = arith.constant 14 : index
    %14 = memref.load %arg2[%c0_14, %c14] : memref<1x32xf32, #tpu.memory_space<smem>>
    %c0_15 = arith.constant 0 : index
    %c15 = arith.constant 15 : index
    %15 = memref.load %arg2[%c0_15, %c15] : memref<1x32xf32, #tpu.memory_space<smem>>
    %c0_16 = arith.constant 0 : index
    %c16 = arith.constant 16 : index
    %16 = memref.load %arg2[%c0_16, %c16] : memref<1x32xf32, #tpu.memory_space<smem>>
    %c0_17 = arith.constant 0 : index
    %c17 = arith.constant 17 : index
    %17 = memref.load %arg2[%c0_17, %c17] : memref<1x32xf32, #tpu.memory_space<smem>>
    %c0_18 = arith.constant 0 : index
    %c18 = arith.constant 18 : index
    %18 = memref.load %arg2[%c0_18, %c18] : memref<1x32xf32, #tpu.memory_space<smem>>
    %c0_19 = arith.constant 0 : index
    %c19 = arith.constant 19 : index
    %19 = memref.load %arg2[%c0_19, %c19] : memref<1x32xf32, #tpu.memory_space<smem>>
    %c0_20 = arith.constant 0 : index
    %c20 = arith.constant 20 : index
    %20 = memref.load %arg2[%c0_20, %c20] : memref<1x32xf32, #tpu.memory_space<smem>>
    %c0_21 = arith.constant 0 : index
    %c21 = arith.constant 21 : index
    %21 = memref.load %arg2[%c0_21, %c21] : memref<1x32xf32, #tpu.memory_space<smem>>
    %c0_22 = arith.constant 0 : index
    %c22 = arith.constant 22 : index
    %22 = memref.load %arg2[%c0_22, %c22] : memref<1x32xf32, #tpu.memory_space<smem>>
    %c0_23 = arith.constant 0 : index
    %c23 = arith.constant 23 : index
    %23 = memref.load %arg2[%c0_23, %c23] : memref<1x32xf32, #tpu.memory_space<smem>>
    %c0_24 = arith.constant 0 : index
    %c24 = arith.constant 24 : index
    %24 = memref.load %arg2[%c0_24, %c24] : memref<1x32xf32, #tpu.memory_space<smem>>
    %c0_25 = arith.constant 0 : index
    %c25 = arith.constant 25 : index
    %25 = memref.load %arg2[%c0_25, %c25] : memref<1x32xf32, #tpu.memory_space<smem>>
    %c0_26 = arith.constant 0 : index
    %c26 = arith.constant 26 : index
    %26 = memref.load %arg2[%c0_26, %c26] : memref<1x32xf32, #tpu.memory_space<smem>>
    %c0_27 = arith.constant 0 : index
    %c27 = arith.constant 27 : index
    %27 = memref.load %arg2[%c0_27, %c27] : memref<1x32xf32, #tpu.memory_space<smem>>
    %c0_28 = arith.constant 0 : index
    %c28 = arith.constant 28 : index
    %28 = memref.load %arg2[%c0_28, %c28] : memref<1x32xf32, #tpu.memory_space<smem>>
    %c0_29 = arith.constant 0 : index
    %c29 = arith.constant 29 : index
    %29 = memref.load %arg2[%c0_29, %c29] : memref<1x32xf32, #tpu.memory_space<smem>>
    %c0_30 = arith.constant 0 : index
    %c30 = arith.constant 30 : index
    %30 = memref.load %arg2[%c0_30, %c30] : memref<1x32xf32, #tpu.memory_space<smem>>
    %c0_31 = arith.constant 0 : index
    %c31 = arith.constant 31 : index
    %31 = memref.load %arg2[%c0_31, %c31] : memref<1x32xf32, #tpu.memory_space<smem>>
    %c0_32 = arith.constant 0 : index
    %32 = memref.load %arg3[%c0_32] : memref<32xf32, #tpu.memory_space<smem>>
    %c1_33 = arith.constant 1 : index
    %33 = memref.load %arg3[%c1_33] : memref<32xf32, #tpu.memory_space<smem>>
    %c2_34 = arith.constant 2 : index
    %34 = memref.load %arg3[%c2_34] : memref<32xf32, #tpu.memory_space<smem>>
    %c3_35 = arith.constant 3 : index
    %35 = memref.load %arg3[%c3_35] : memref<32xf32, #tpu.memory_space<smem>>
    %c4_36 = arith.constant 4 : index
    %36 = memref.load %arg3[%c4_36] : memref<32xf32, #tpu.memory_space<smem>>
    %c5_37 = arith.constant 5 : index
    %37 = memref.load %arg3[%c5_37] : memref<32xf32, #tpu.memory_space<smem>>
    %c6_38 = arith.constant 6 : index
    %38 = memref.load %arg3[%c6_38] : memref<32xf32, #tpu.memory_space<smem>>
    %c7_39 = arith.constant 7 : index
    %39 = memref.load %arg3[%c7_39] : memref<32xf32, #tpu.memory_space<smem>>
    %c8_40 = arith.constant 8 : index
    %40 = memref.load %arg3[%c8_40] : memref<32xf32, #tpu.memory_space<smem>>
    %c9_41 = arith.constant 9 : index
    %41 = memref.load %arg3[%c9_41] : memref<32xf32, #tpu.memory_space<smem>>
    %c10_42 = arith.constant 10 : index
    %42 = memref.load %arg3[%c10_42] : memref<32xf32, #tpu.memory_space<smem>>
    %c11_43 = arith.constant 11 : index
    %43 = memref.load %arg3[%c11_43] : memref<32xf32, #tpu.memory_space<smem>>
    %c12_44 = arith.constant 12 : index
    %44 = memref.load %arg3[%c12_44] : memref<32xf32, #tpu.memory_space<smem>>
    %c13_45 = arith.constant 13 : index
    %45 = memref.load %arg3[%c13_45] : memref<32xf32, #tpu.memory_space<smem>>
    %c14_46 = arith.constant 14 : index
    %46 = memref.load %arg3[%c14_46] : memref<32xf32, #tpu.memory_space<smem>>
    %c15_47 = arith.constant 15 : index
    %47 = memref.load %arg3[%c15_47] : memref<32xf32, #tpu.memory_space<smem>>
    %c16_48 = arith.constant 16 : index
    %48 = memref.load %arg3[%c16_48] : memref<32xf32, #tpu.memory_space<smem>>
    %c17_49 = arith.constant 17 : index
    %49 = memref.load %arg3[%c17_49] : memref<32xf32, #tpu.memory_space<smem>>
    %c18_50 = arith.constant 18 : index
    %50 = memref.load %arg3[%c18_50] : memref<32xf32, #tpu.memory_space<smem>>
    %c19_51 = arith.constant 19 : index
    %51 = memref.load %arg3[%c19_51] : memref<32xf32, #tpu.memory_space<smem>>
    %c20_52 = arith.constant 20 : index
    %52 = memref.load %arg3[%c20_52] : memref<32xf32, #tpu.memory_space<smem>>
    %c21_53 = arith.constant 21 : index
    %53 = memref.load %arg3[%c21_53] : memref<32xf32, #tpu.memory_space<smem>>
    %c22_54 = arith.constant 22 : index
    %54 = memref.load %arg3[%c22_54] : memref<32xf32, #tpu.memory_space<smem>>
    %c23_55 = arith.constant 23 : index
    %55 = memref.load %arg3[%c23_55] : memref<32xf32, #tpu.memory_space<smem>>
    %c24_56 = arith.constant 24 : index
    %56 = memref.load %arg3[%c24_56] : memref<32xf32, #tpu.memory_space<smem>>
    %c25_57 = arith.constant 25 : index
    %57 = memref.load %arg3[%c25_57] : memref<32xf32, #tpu.memory_space<smem>>
    %c26_58 = arith.constant 26 : index
    %58 = memref.load %arg3[%c26_58] : memref<32xf32, #tpu.memory_space<smem>>
    %c27_59 = arith.constant 27 : index
    %59 = memref.load %arg3[%c27_59] : memref<32xf32, #tpu.memory_space<smem>>
    %c28_60 = arith.constant 28 : index
    %60 = memref.load %arg3[%c28_60] : memref<32xf32, #tpu.memory_space<smem>>
    %c29_61 = arith.constant 29 : index
    %61 = memref.load %arg3[%c29_61] : memref<32xf32, #tpu.memory_space<smem>>
    %c30_62 = arith.constant 30 : index
    %62 = memref.load %arg3[%c30_62] : memref<32xf32, #tpu.memory_space<smem>>
    %c31_63 = arith.constant 31 : index
    %63 = memref.load %arg3[%c31_63] : memref<32xf32, #tpu.memory_space<smem>>
    %c0_64 = arith.constant 0 : index
    %64 = memref.load %arg4[%c0_64] : memref<32xf32, #tpu.memory_space<smem>>
    %c1_65 = arith.constant 1 : index
    %65 = memref.load %arg4[%c1_65] : memref<32xf32, #tpu.memory_space<smem>>
    %c2_66 = arith.constant 2 : index
    %66 = memref.load %arg4[%c2_66] : memref<32xf32, #tpu.memory_space<smem>>
    %c3_67 = arith.constant 3 : index
    %67 = memref.load %arg4[%c3_67] : memref<32xf32, #tpu.memory_space<smem>>
    %c4_68 = arith.constant 4 : index
    %68 = memref.load %arg4[%c4_68] : memref<32xf32, #tpu.memory_space<smem>>
    %c5_69 = arith.constant 5 : index
    %69 = memref.load %arg4[%c5_69] : memref<32xf32, #tpu.memory_space<smem>>
    %c6_70 = arith.constant 6 : index
    %70 = memref.load %arg4[%c6_70] : memref<32xf32, #tpu.memory_space<smem>>
    %c7_71 = arith.constant 7 : index
    %71 = memref.load %arg4[%c7_71] : memref<32xf32, #tpu.memory_space<smem>>
    %c8_72 = arith.constant 8 : index
    %72 = memref.load %arg4[%c8_72] : memref<32xf32, #tpu.memory_space<smem>>
    %c9_73 = arith.constant 9 : index
    %73 = memref.load %arg4[%c9_73] : memref<32xf32, #tpu.memory_space<smem>>
    %c10_74 = arith.constant 10 : index
    %74 = memref.load %arg4[%c10_74] : memref<32xf32, #tpu.memory_space<smem>>
    %c11_75 = arith.constant 11 : index
    %75 = memref.load %arg4[%c11_75] : memref<32xf32, #tpu.memory_space<smem>>
    %c12_76 = arith.constant 12 : index
    %76 = memref.load %arg4[%c12_76] : memref<32xf32, #tpu.memory_space<smem>>
    %c13_77 = arith.constant 13 : index
    %77 = memref.load %arg4[%c13_77] : memref<32xf32, #tpu.memory_space<smem>>
    %c14_78 = arith.constant 14 : index
    %78 = memref.load %arg4[%c14_78] : memref<32xf32, #tpu.memory_space<smem>>
    %c15_79 = arith.constant 15 : index
    %79 = memref.load %arg4[%c15_79] : memref<32xf32, #tpu.memory_space<smem>>
    %c16_80 = arith.constant 16 : index
    %80 = memref.load %arg4[%c16_80] : memref<32xf32, #tpu.memory_space<smem>>
    %c17_81 = arith.constant 17 : index
    %81 = memref.load %arg4[%c17_81] : memref<32xf32, #tpu.memory_space<smem>>
    %c18_82 = arith.constant 18 : index
    %82 = memref.load %arg4[%c18_82] : memref<32xf32, #tpu.memory_space<smem>>
    %c19_83 = arith.constant 19 : index
    %83 = memref.load %arg4[%c19_83] : memref<32xf32, #tpu.memory_space<smem>>
    %c20_84 = arith.constant 20 : index
    %84 = memref.load %arg4[%c20_84] : memref<32xf32, #tpu.memory_space<smem>>
    %c21_85 = arith.constant 21 : index
    %85 = memref.load %arg4[%c21_85] : memref<32xf32, #tpu.memory_space<smem>>
    %c22_86 = arith.constant 22 : index
    %86 = memref.load %arg4[%c22_86] : memref<32xf32, #tpu.memory_space<smem>>
    %c23_87 = arith.constant 23 : index
    %87 = memref.load %arg4[%c23_87] : memref<32xf32, #tpu.memory_space<smem>>
    %c24_88 = arith.constant 24 : index
    %88 = memref.load %arg4[%c24_88] : memref<32xf32, #tpu.memory_space<smem>>
    %c25_89 = arith.constant 25 : index
    %89 = memref.load %arg4[%c25_89] : memref<32xf32, #tpu.memory_space<smem>>
    %c26_90 = arith.constant 26 : index
    %90 = memref.load %arg4[%c26_90] : memref<32xf32, #tpu.memory_space<smem>>
    %c27_91 = arith.constant 27 : index
    %91 = memref.load %arg4[%c27_91] : memref<32xf32, #tpu.memory_space<smem>>
    %c28_92 = arith.constant 28 : index
    %92 = memref.load %arg4[%c28_92] : memref<32xf32, #tpu.memory_space<smem>>
    %c29_93 = arith.constant 29 : index
    %93 = memref.load %arg4[%c29_93] : memref<32xf32, #tpu.memory_space<smem>>
    %c30_94 = arith.constant 30 : index
    %94 = memref.load %arg4[%c30_94] : memref<32xf32, #tpu.memory_space<smem>>
    %c31_95 = arith.constant 31 : index
    %95 = memref.load %arg4[%c31_95] : memref<32xf32, #tpu.memory_space<smem>>
    %c0_96 = arith.constant 0 : index
    %96 = memref.load %arg5[%c0_96] : memref<1xf32, #tpu.memory_space<smem>>
    %c0_i32 = arith.constant 0 : i32
    %c8_i32 = arith.constant 8 : i32
    %97 = arith.muli %c0_i32, %c8_i32 : i32
    %98 = tpu.assume_multiple %97, 8 : i32
    %c0_97 = arith.constant 0 : index
    %99 = arith.index_cast %98 : i32 to index
    %c0_98 = arith.constant 0 : index
    %100 = vector.load %arg1[%c0_97, %99, %c0_98] : memref<1x8x128xf32, #tpu.memory_space<vmem>>, vector<1x8x128xf32>
    %101 = vector.shape_cast %100 : vector<1x8x128xf32> to vector<8x128xf32>
    %cst = arith.constant 0.000000e+00 : f32
    %102 = vector.broadcast %cst : f32 to vector<8x128xf32>
    %103 = vector.broadcast %0 : f32 to vector<8x128xf32>
    %104 = arith.mulf %101, %103 : vector<8x128xf32>
    %105 = vector.broadcast %32 : f32 to vector<8x128xf32>
    %106 = arith.addf %104, %105 : vector<8x128xf32>
    %107 = math.tanh %106 : vector<8x128xf32>
    %108 = vector.broadcast %64 : f32 to vector<8x128xf32>
    %109 = arith.mulf %107, %108 : vector<8x128xf32>
    %110 = arith.addf %102, %109 : vector<8x128xf32>
    %111 = vector.broadcast %1 : f32 to vector<8x128xf32>
    %112 = arith.mulf %101, %111 : vector<8x128xf32>
    %113 = vector.broadcast %33 : f32 to vector<8x128xf32>
    %114 = arith.addf %112, %113 : vector<8x128xf32>
    %115 = math.tanh %114 : vector<8x128xf32>
    %116 = vector.broadcast %65 : f32 to vector<8x128xf32>
    %117 = arith.mulf %115, %116 : vector<8x128xf32>
    %118 = arith.addf %110, %117 : vector<8x128xf32>
    %119 = vector.broadcast %2 : f32 to vector<8x128xf32>
    %120 = arith.mulf %101, %119 : vector<8x128xf32>
    %121 = vector.broadcast %34 : f32 to vector<8x128xf32>
    %122 = arith.addf %120, %121 : vector<8x128xf32>
    %123 = math.tanh %122 : vector<8x128xf32>
    %124 = vector.broadcast %66 : f32 to vector<8x128xf32>
    %125 = arith.mulf %123, %124 : vector<8x128xf32>
    %126 = arith.addf %118, %125 : vector<8x128xf32>
    %127 = vector.broadcast %3 : f32 to vector<8x128xf32>
    %128 = arith.mulf %101, %127 : vector<8x128xf32>
    %129 = vector.broadcast %35 : f32 to vector<8x128xf32>
    %130 = arith.addf %128, %129 : vector<8x128xf32>
    %131 = math.tanh %130 : vector<8x128xf32>
    %132 = vector.broadcast %67 : f32 to vector<8x128xf32>
    %133 = arith.mulf %131, %132 : vector<8x128xf32>
    %134 = arith.addf %126, %133 : vector<8x128xf32>
    %135 = vector.broadcast %4 : f32 to vector<8x128xf32>
    %136 = arith.mulf %101, %135 : vector<8x128xf32>
    %137 = vector.broadcast %36 : f32 to vector<8x128xf32>
    %138 = arith.addf %136, %137 : vector<8x128xf32>
    %139 = math.tanh %138 : vector<8x128xf32>
    %140 = vector.broadcast %68 : f32 to vector<8x128xf32>
    %141 = arith.mulf %139, %140 : vector<8x128xf32>
    %142 = arith.addf %134, %141 : vector<8x128xf32>
    %143 = vector.broadcast %5 : f32 to vector<8x128xf32>
    %144 = arith.mulf %101, %143 : vector<8x128xf32>
    %145 = vector.broadcast %37 : f32 to vector<8x128xf32>
    %146 = arith.addf %144, %145 : vector<8x128xf32>
    %147 = math.tanh %146 : vector<8x128xf32>
    %148 = vector.broadcast %69 : f32 to vector<8x128xf32>
    %149 = arith.mulf %147, %148 : vector<8x128xf32>
    %150 = arith.addf %142, %149 : vector<8x128xf32>
    %151 = vector.broadcast %6 : f32 to vector<8x128xf32>
    %152 = arith.mulf %101, %151 : vector<8x128xf32>
    %153 = vector.broadcast %38 : f32 to vector<8x128xf32>
    %154 = arith.addf %152, %153 : vector<8x128xf32>
    %155 = math.tanh %154 : vector<8x128xf32>
    %156 = vector.broadcast %70 : f32 to vector<8x128xf32>
    %157 = arith.mulf %155, %156 : vector<8x128xf32>
    %158 = arith.addf %150, %157 : vector<8x128xf32>
    %159 = vector.broadcast %7 : f32 to vector<8x128xf32>
    %160 = arith.mulf %101, %159 : vector<8x128xf32>
    %161 = vector.broadcast %39 : f32 to vector<8x128xf32>
    %162 = arith.addf %160, %161 : vector<8x128xf32>
    %163 = math.tanh %162 : vector<8x128xf32>
    %164 = vector.broadcast %71 : f32 to vector<8x128xf32>
    %165 = arith.mulf %163, %164 : vector<8x128xf32>
    %166 = arith.addf %158, %165 : vector<8x128xf32>
    %167 = vector.broadcast %8 : f32 to vector<8x128xf32>
    %168 = arith.mulf %101, %167 : vector<8x128xf32>
    %169 = vector.broadcast %40 : f32 to vector<8x128xf32>
    %170 = arith.addf %168, %169 : vector<8x128xf32>
    %171 = math.tanh %170 : vector<8x128xf32>
    %172 = vector.broadcast %72 : f32 to vector<8x128xf32>
    %173 = arith.mulf %171, %172 : vector<8x128xf32>
    %174 = arith.addf %166, %173 : vector<8x128xf32>
    %175 = vector.broadcast %9 : f32 to vector<8x128xf32>
    %176 = arith.mulf %101, %175 : vector<8x128xf32>
    %177 = vector.broadcast %41 : f32 to vector<8x128xf32>
    %178 = arith.addf %176, %177 : vector<8x128xf32>
    %179 = math.tanh %178 : vector<8x128xf32>
    %180 = vector.broadcast %73 : f32 to vector<8x128xf32>
    %181 = arith.mulf %179, %180 : vector<8x128xf32>
    %182 = arith.addf %174, %181 : vector<8x128xf32>
    %183 = vector.broadcast %10 : f32 to vector<8x128xf32>
    %184 = arith.mulf %101, %183 : vector<8x128xf32>
    %185 = vector.broadcast %42 : f32 to vector<8x128xf32>
    %186 = arith.addf %184, %185 : vector<8x128xf32>
    %187 = math.tanh %186 : vector<8x128xf32>
    %188 = vector.broadcast %74 : f32 to vector<8x128xf32>
    %189 = arith.mulf %187, %188 : vector<8x128xf32>
    %190 = arith.addf %182, %189 : vector<8x128xf32>
    %191 = vector.broadcast %11 : f32 to vector<8x128xf32>
    %192 = arith.mulf %101, %191 : vector<8x128xf32>
    %193 = vector.broadcast %43 : f32 to vector<8x128xf32>
    %194 = arith.addf %192, %193 : vector<8x128xf32>
    %195 = math.tanh %194 : vector<8x128xf32>
    %196 = vector.broadcast %75 : f32 to vector<8x128xf32>
    %197 = arith.mulf %195, %196 : vector<8x128xf32>
    %198 = arith.addf %190, %197 : vector<8x128xf32>
    %199 = vector.broadcast %12 : f32 to vector<8x128xf32>
    %200 = arith.mulf %101, %199 : vector<8x128xf32>
    %201 = vector.broadcast %44 : f32 to vector<8x128xf32>
    %202 = arith.addf %200, %201 : vector<8x128xf32>
    %203 = math.tanh %202 : vector<8x128xf32>
    %204 = vector.broadcast %76 : f32 to vector<8x128xf32>
    %205 = arith.mulf %203, %204 : vector<8x128xf32>
    %206 = arith.addf %198, %205 : vector<8x128xf32>
    %207 = vector.broadcast %13 : f32 to vector<8x128xf32>
    %208 = arith.mulf %101, %207 : vector<8x128xf32>
    %209 = vector.broadcast %45 : f32 to vector<8x128xf32>
    %210 = arith.addf %208, %209 : vector<8x128xf32>
    %211 = math.tanh %210 : vector<8x128xf32>
    %212 = vector.broadcast %77 : f32 to vector<8x128xf32>
    %213 = arith.mulf %211, %212 : vector<8x128xf32>
    %214 = arith.addf %206, %213 : vector<8x128xf32>
    %215 = vector.broadcast %14 : f32 to vector<8x128xf32>
    %216 = arith.mulf %101, %215 : vector<8x128xf32>
    %217 = vector.broadcast %46 : f32 to vector<8x128xf32>
    %218 = arith.addf %216, %217 : vector<8x128xf32>
    %219 = math.tanh %218 : vector<8x128xf32>
    %220 = vector.broadcast %78 : f32 to vector<8x128xf32>
    %221 = arith.mulf %219, %220 : vector<8x128xf32>
    %222 = arith.addf %214, %221 : vector<8x128xf32>
    %223 = vector.broadcast %15 : f32 to vector<8x128xf32>
    %224 = arith.mulf %101, %223 : vector<8x128xf32>
    %225 = vector.broadcast %47 : f32 to vector<8x128xf32>
    %226 = arith.addf %224, %225 : vector<8x128xf32>
    %227 = math.tanh %226 : vector<8x128xf32>
    %228 = vector.broadcast %79 : f32 to vector<8x128xf32>
    %229 = arith.mulf %227, %228 : vector<8x128xf32>
    %230 = arith.addf %222, %229 : vector<8x128xf32>
    %231 = vector.broadcast %16 : f32 to vector<8x128xf32>
    %232 = arith.mulf %101, %231 : vector<8x128xf32>
    %233 = vector.broadcast %48 : f32 to vector<8x128xf32>
    %234 = arith.addf %232, %233 : vector<8x128xf32>
    %235 = math.tanh %234 : vector<8x128xf32>
    %236 = vector.broadcast %80 : f32 to vector<8x128xf32>
    %237 = arith.mulf %235, %236 : vector<8x128xf32>
    %238 = arith.addf %230, %237 : vector<8x128xf32>
    %239 = vector.broadcast %17 : f32 to vector<8x128xf32>
    %240 = arith.mulf %101, %239 : vector<8x128xf32>
    %241 = vector.broadcast %49 : f32 to vector<8x128xf32>
    %242 = arith.addf %240, %241 : vector<8x128xf32>
    %243 = math.tanh %242 : vector<8x128xf32>
    %244 = vector.broadcast %81 : f32 to vector<8x128xf32>
    %245 = arith.mulf %243, %244 : vector<8x128xf32>
    %246 = arith.addf %238, %245 : vector<8x128xf32>
    %247 = vector.broadcast %18 : f32 to vector<8x128xf32>
    %248 = arith.mulf %101, %247 : vector<8x128xf32>
    %249 = vector.broadcast %50 : f32 to vector<8x128xf32>
    %250 = arith.addf %248, %249 : vector<8x128xf32>
    %251 = math.tanh %250 : vector<8x128xf32>
    %252 = vector.broadcast %82 : f32 to vector<8x128xf32>
    %253 = arith.mulf %251, %252 : vector<8x128xf32>
    %254 = arith.addf %246, %253 : vector<8x128xf32>
    %255 = vector.broadcast %19 : f32 to vector<8x128xf32>
    %256 = arith.mulf %101, %255 : vector<8x128xf32>
    %257 = vector.broadcast %51 : f32 to vector<8x128xf32>
    %258 = arith.addf %256, %257 : vector<8x128xf32>
    %259 = math.tanh %258 : vector<8x128xf32>
    %260 = vector.broadcast %83 : f32 to vector<8x128xf32>
    %261 = arith.mulf %259, %260 : vector<8x128xf32>
    %262 = arith.addf %254, %261 : vector<8x128xf32>
    %263 = vector.broadcast %20 : f32 to vector<8x128xf32>
    %264 = arith.mulf %101, %263 : vector<8x128xf32>
    %265 = vector.broadcast %52 : f32 to vector<8x128xf32>
    %266 = arith.addf %264, %265 : vector<8x128xf32>
    %267 = math.tanh %266 : vector<8x128xf32>
    %268 = vector.broadcast %84 : f32 to vector<8x128xf32>
    %269 = arith.mulf %267, %268 : vector<8x128xf32>
    %270 = arith.addf %262, %269 : vector<8x128xf32>
    %271 = vector.broadcast %21 : f32 to vector<8x128xf32>
    %272 = arith.mulf %101, %271 : vector<8x128xf32>
    %273 = vector.broadcast %53 : f32 to vector<8x128xf32>
    %274 = arith.addf %272, %273 : vector<8x128xf32>
    %275 = math.tanh %274 : vector<8x128xf32>
    %276 = vector.broadcast %85 : f32 to vector<8x128xf32>
    %277 = arith.mulf %275, %276 : vector<8x128xf32>
    %278 = arith.addf %270, %277 : vector<8x128xf32>
    %279 = vector.broadcast %22 : f32 to vector<8x128xf32>
    %280 = arith.mulf %101, %279 : vector<8x128xf32>
    %281 = vector.broadcast %54 : f32 to vector<8x128xf32>
    %282 = arith.addf %280, %281 : vector<8x128xf32>
    %283 = math.tanh %282 : vector<8x128xf32>
    %284 = vector.broadcast %86 : f32 to vector<8x128xf32>
    %285 = arith.mulf %283, %284 : vector<8x128xf32>
    %286 = arith.addf %278, %285 : vector<8x128xf32>
    %287 = vector.broadcast %23 : f32 to vector<8x128xf32>
    %288 = arith.mulf %101, %287 : vector<8x128xf32>
    %289 = vector.broadcast %55 : f32 to vector<8x128xf32>
    %290 = arith.addf %288, %289 : vector<8x128xf32>
    %291 = math.tanh %290 : vector<8x128xf32>
    %292 = vector.broadcast %87 : f32 to vector<8x128xf32>
    %293 = arith.mulf %291, %292 : vector<8x128xf32>
    %294 = arith.addf %286, %293 : vector<8x128xf32>
    %295 = vector.broadcast %24 : f32 to vector<8x128xf32>
    %296 = arith.mulf %101, %295 : vector<8x128xf32>
    %297 = vector.broadcast %56 : f32 to vector<8x128xf32>
    %298 = arith.addf %296, %297 : vector<8x128xf32>
    %299 = math.tanh %298 : vector<8x128xf32>
    %300 = vector.broadcast %88 : f32 to vector<8x128xf32>
    %301 = arith.mulf %299, %300 : vector<8x128xf32>
    %302 = arith.addf %294, %301 : vector<8x128xf32>
    %303 = vector.broadcast %25 : f32 to vector<8x128xf32>
    %304 = arith.mulf %101, %303 : vector<8x128xf32>
    %305 = vector.broadcast %57 : f32 to vector<8x128xf32>
    %306 = arith.addf %304, %305 : vector<8x128xf32>
    %307 = math.tanh %306 : vector<8x128xf32>
    %308 = vector.broadcast %89 : f32 to vector<8x128xf32>
    %309 = arith.mulf %307, %308 : vector<8x128xf32>
    %310 = arith.addf %302, %309 : vector<8x128xf32>
    %311 = vector.broadcast %26 : f32 to vector<8x128xf32>
    %312 = arith.mulf %101, %311 : vector<8x128xf32>
    %313 = vector.broadcast %58 : f32 to vector<8x128xf32>
    %314 = arith.addf %312, %313 : vector<8x128xf32>
    %315 = math.tanh %314 : vector<8x128xf32>
    %316 = vector.broadcast %90 : f32 to vector<8x128xf32>
    %317 = arith.mulf %315, %316 : vector<8x128xf32>
    %318 = arith.addf %310, %317 : vector<8x128xf32>
    %319 = vector.broadcast %27 : f32 to vector<8x128xf32>
    %320 = arith.mulf %101, %319 : vector<8x128xf32>
    %321 = vector.broadcast %59 : f32 to vector<8x128xf32>
    %322 = arith.addf %320, %321 : vector<8x128xf32>
    %323 = math.tanh %322 : vector<8x128xf32>
    %324 = vector.broadcast %91 : f32 to vector<8x128xf32>
    %325 = arith.mulf %323, %324 : vector<8x128xf32>
    %326 = arith.addf %318, %325 : vector<8x128xf32>
    %327 = vector.broadcast %28 : f32 to vector<8x128xf32>
    %328 = arith.mulf %101, %327 : vector<8x128xf32>
    %329 = vector.broadcast %60 : f32 to vector<8x128xf32>
    %330 = arith.addf %328, %329 : vector<8x128xf32>
    %331 = math.tanh %330 : vector<8x128xf32>
    %332 = vector.broadcast %92 : f32 to vector<8x128xf32>
    %333 = arith.mulf %331, %332 : vector<8x128xf32>
    %334 = arith.addf %326, %333 : vector<8x128xf32>
    %335 = vector.broadcast %29 : f32 to vector<8x128xf32>
    %336 = arith.mulf %101, %335 : vector<8x128xf32>
    %337 = vector.broadcast %61 : f32 to vector<8x128xf32>
    %338 = arith.addf %336, %337 : vector<8x128xf32>
    %339 = math.tanh %338 : vector<8x128xf32>
    %340 = vector.broadcast %93 : f32 to vector<8x128xf32>
    %341 = arith.mulf %339, %340 : vector<8x128xf32>
    %342 = arith.addf %334, %341 : vector<8x128xf32>
    %343 = vector.broadcast %30 : f32 to vector<8x128xf32>
    %344 = arith.mulf %101, %343 : vector<8x128xf32>
    %345 = vector.broadcast %62 : f32 to vector<8x128xf32>
    %346 = arith.addf %344, %345 : vector<8x128xf32>
    %347 = math.tanh %346 : vector<8x128xf32>
    %348 = vector.broadcast %94 : f32 to vector<8x128xf32>
    %349 = arith.mulf %347, %348 : vector<8x128xf32>
    %350 = arith.addf %342, %349 : vector<8x128xf32>
    %351 = vector.broadcast %31 : f32 to vector<8x128xf32>
    %352 = arith.mulf %101, %351 : vector<8x128xf32>
    %353 = vector.broadcast %63 : f32 to vector<8x128xf32>
    %354 = arith.addf %352, %353 : vector<8x128xf32>
    %355 = math.tanh %354 : vector<8x128xf32>
    %356 = vector.broadcast %95 : f32 to vector<8x128xf32>
    %357 = arith.mulf %355, %356 : vector<8x128xf32>
    %358 = arith.addf %350, %357 : vector<8x128xf32>
    %359 = vector.broadcast %96 : f32 to vector<8x128xf32>
    %360 = arith.addf %358, %359 : vector<8x128xf32>
    %361 = arith.index_cast %98 : i32 to index
    %c0_99 = arith.constant 0 : index
    %362 = vector.load %arg6[%361, %c0_99] : memref<8x128xf32, #tpu.memory_space<vmem>>, vector<8x128xf32>
    tpu.vector_store %arg6[%361, %c0_99], %360 {strides = array<i32>} : memref<8x128xf32, #tpu.memory_space<vmem>>, vector<8x128xf32>,
    %c1_i32 = arith.constant 1 : i32
    return
  }
  func.func @transform_0(%arg0: i32) -> (i32, i32, i32) {
    %c0_i32 = arith.constant 0 : i32
    %c0_i32_0 = arith.constant 0 : i32
    %c0_i32_1 = arith.constant 0 : i32
    return %c0_i32, %arg0, %c0_i32_0 : i32, i32, i32
  }
  func.func @transform_1(%arg0: i32) -> (i32, i32) {
    %c0_i32 = arith.constant 0 : i32
    %c0_i32_0 = arith.constant 0 : i32
    %c0_i32_1 = arith.constant 0 : i32
    return %c0_i32, %c0_i32_0 : i32, i32
  }
  func.func @transform_2(%arg0: i32) -> i32 {
    %c0_i32 = arith.constant 0 : i32
    %c0_i32_0 = arith.constant 0 : i32
    return %c0_i32 : i32
  }
  func.func @transform_3(%arg0: i32) -> i32 {
    %c0_i32 = arith.constant 0 : i32
    %c0_i32_0 = arith.constant 0 : i32
    return %c0_i32 : i32
  }
  func.func @transform_4(%arg0: i32) -> i32 {
    %c0_i32 = arith.constant 0 : i32
    %c0_i32_0 = arith.constant 0 : i32
    return %c0_i32 : i32
  }
  func.func @transform_5(%arg0: i32) -> (i32, i32) {
    %c0_i32 = arith.constant 0 : i32
    %c0_i32_0 = arith.constant 0 : i32
    return %arg0, %c0_i32 : i32, i32
  }
}

</mosaic_0001>

<bundles_post_ra>
// kernel: tpu_custom_call.1
= control target key start
LH: loop header
LB: loop body
LE: loop exit
PB: predicated region body
PF: predicated region fallthrough
CT: control target
= control target key end

     0   :  { %11 = vsyncpa [#allocation4], 0  ;;  %s1048_s0 = inlined_call_operand.hbm [shape: f32[1,8,128], index: 0, kind: input, shape index: {}]   ;;  %s1049_s1 = inlined_call_operand.vmem [shape: f32[1,32], index: 1, kind: input, shape index: {}]   ;;  %s1050_s2 = inlined_call_operand.vmem [shape: f32[32], index: 2, kind: input, shape index: {}]   ;;  %s1051_s3 = inlined_call_operand.vmem [shape: f32[32], index: 3, kind: input, shape index: {}]   ;;  %s1052_s4 = inlined_call_operand.<no memory space> [shape: f32[1], index: 4, kind: input, shape index: {}]   ;;  %s1053_s5 = inlined_call_operand.hbm [shape: f32[8,128], index: 5, kind: output, shape index: {}]  }
   0x1   :  { %12 = vsyncpa [#allocation6], 0 }
   0x2   :  { %13 = vsyncpa [#allocation9], 0  ;;  %s41_s20 = sshll.u32 %s1050_s2, 4  ;;  %s42_s20 = int_to_ptr.vmem [resolvable:$true] %s41_s20 }
   0x3   :  { %14 = vsyncpa [#allocation5], 0  ;;  %s606_s21 = scalar_lea.vmem %s42_s20, 16  ;;  %p611_p1 = scmp.lt.s32.totalorder %s42_s20, %s42_s20 }
   0x4   :  { %p607_p0 = scmp.ne.s32.totalorder %s42_s20, %s606_s21  ;;  %p612_p2 = scmp.lt.s32.totalorder %s606_s21, %s606_s21 }
   0x6   :  { %p613_p3 = por %p612_p2, %p611_p1 }
   0x8   :  { %p614_p4 = pnand %p613_p3, %p607_p0 }
   0xa   :  { %617 = shalt.err (!%p614_p4)
}
   0xb   :  { %s694_s22 = smov [#allocation8]   ;;  %s695_s23 = smov [#allocation3]  }
   0xc   :  { %44 = dma.vmem_to_smem %s42_s20, 16, %s694_s22, [#allocation9]  }
   0xd   :  { %s21_s24 = sshll.u32 %s695_s23, 4  ;;  %s31_s27 = sshll.u32 %s1049_s1, 4  ;;  %s22_s24 = int_to_ptr.vmem [resolvable:$true] %s21_s24  ;;  %s32_s27 = int_to_ptr.vmem [resolvable:$true] %s31_s27 }
   0xe   :  { %s618_s29 = scalar_lea.hbm %s1048_s0, 128 }
   0xf   :  { %p619_p5 = scmp.ne.s32.totalorder %s1048_s0, %s618_s29  ;;  %p622_p6 = scmp.lt.u32.totalorder %s618_s29, %s1048_s0 }
  0x11   :  { %p624_p7 = pnand %p622_p6, %p619_p5 }
  0x13   :  { %627 = shalt.err (!%p624_p7)
}
  0x14   :  { %s628_s9 = scalar_lea.vmem %s22_s24, 128  ;;  %p633_p9 = scmp.lt.s32.totalorder %s22_s24, %s22_s24 }
  0x15   :  { %p629_p8 = scmp.ne.s32.totalorder %s22_s24, %s628_s9  ;;  %p634_p10 = scmp.lt.s32.totalorder %s628_s9, %s628_s9 }
  0x17   :  { %p635_p11 = por %p634_p10, %p633_p9 }
  0x19   :  { %p636_p12 = pnand %p635_p11, %p629_p8 }
  0x1b   :  { %639 = shalt.err (!%p636_p12)
}
  0x1c   :  { %24 = dma.hbm_to_vmem [thread:$0]  %s1048_s0, 128, %s22_s24, [#allocation4]  }
  0x1d   :  { %s51_s13 = sshll.u32 %s1051_s3, 4  ;;  %s640_s14 = scalar_lea.vmem %s32_s27, 16  ;;  %s52_s13 = int_to_ptr.vmem [resolvable:$true] %s51_s13 }
  0x1e   :  { %p641_p13 = scmp.ne.s32.totalorder %s32_s27, %s640_s14  ;;  %p645_p0 = scmp.lt.s32.totalorder %s32_s27, %s32_s27 }
  0x1f   :  { %p646_p1 = scmp.lt.s32.totalorder %s640_s14, %s640_s14 }
  0x21   :  { %p647_p2 = por %p646_p1, %p645_p0 }
  0x23   :  { %p648_p3 = pnand %p647_p2, %p641_p13 }
  0x25   :  { %651 = shalt.err (!%p648_p3)
}
  0x26   :  { %s696_s15 = smov [#allocation7]   ;;  %s652_s16 = scalar_lea.vmem %s52_s13, 16 }
  0x27   :  { %34 = dma.vmem_to_smem %s32_s27, 16, %s696_s15, [#allocation6]  }
  0x28   :  { %p653_p4 = scmp.ne.s32.totalorder %s52_s13, %s652_s16  ;;  %p657_p5 = scmp.lt.s32.totalorder %s52_s13, %s52_s13 }
  0x29   :  { %p658_p6 = scmp.lt.s32.totalorder %s652_s16, %s652_s16 }
  0x2b   :  { %p659_p7 = por %p658_p6, %p657_p5 }
  0x2d   :  { %p660_p8 = pnand %p659_p7, %p653_p4 }
  0x2f   :  { %663 = shalt.err (!%p660_p8)
}
  0x30   :  { %s697_s0 = smov [#allocation10]  }
  0x31   :  { %54 = dma.vmem_to_smem %s52_s13, 16, %s697_s0, [#allocation9]  }
  0x32   :  { %686 = dma.done.wait [#allocation4], 128  }
  0x33   :  { %687 = vsyncadd [#allocation4], 4294967168 }
  0x34   :  { %688 = dma.done.wait [#allocation6], 16  }
  0x35   :  { %689 = vsyncadd [#allocation6], 4294967280 }
  0x36   :  { %690 = dma.done.wait [#allocation9], 32  }
  0x37   :  { %691 = vsyncadd [#allocation9], 4294967264 }
  0x38   :  { %69 = sfence }
  0x39   :  { %s70_s3 = sld [smem:[#allocation7]]  ;;  %s444_s17 = sld [smem:[#allocation7 + $0x1]]  ;;  %v756_v0 = vld [vmem:[#allocation3] sm:$0xff] }
  0x3a   :  { %s445_s18 = sld [smem:[#allocation7 + $0x2]]  ;;  %s446_s19 = sld [smem:[#allocation7 + $0x3]] }
  0x3b   :  { %s447_s20 = sld [smem:[#allocation7 + $0x4]]  ;;  %s750_s21 = sld [smem:[#allocation7 + $0x5]] }
  0x3c   :  { %s752_s22 = sld [smem:[#allocation7 + $0x6]]  ;;  %s754_s23 = sld [smem:[#allocation7 + $0x7]] }
  0x3d   :  { %s102_s24 = sld [smem:[#allocation8]]  ;;  %s475_s25 = sld [smem:[#allocation8 + $0x1]] }
  0x3e   :  { %s476_s26 = sld [smem:[#allocation8 + $0x2]]  ;;  %s477_s27 = sld [smem:[#allocation8 + $0x3]] }
  0x3f   :  { %v168_v1 = vstv %s70_s3  ;;  %v176_v2 = vstv %s444_s17  ;;  %s758_s2 = sld [smem:[#allocation8 + $0x4]]  ;;  %s760_s28 = sld [smem:[#allocation8 + $0x5]] }
  0x40   :  { %v184_v3 = vstv %s445_s18  ;;  %v192_v4 = vstv %s446_s19  ;;  %s762_s29 = sld [smem:[#allocation7 + $0x8]]  ;;  %s764_s30 = sld [smem:[#allocation8 + $0x6]]  ;;  %v169_v5 = vmul.f32 %v168_v1, %v756_v0  ;;  %v177_v6 = vmul.f32 %v176_v2, %v756_v0 }
  0x41   :  { %v200_v7 = vstv %s447_s20  ;;  %v185_v8 = vmul.f32 %v184_v3, %v756_v0  ;;  %v193_v9 = vmul.f32 %v192_v4, %v756_v0  ;;  %s770_s6 = sld [smem:[#allocation7 + $0x9]]  ;;  %s772_s7 = sld [smem:[#allocation8 + $0x7]]  ;;  %v208_v10 = vstv %s750_s21 }
  0x42   :  { %s775_s8 = sld [smem:[#allocation7 + $0xa]]  ;;  %v201_v13 = vmul.f32 %v200_v7, %v756_v0  ;;  %v216_v14 = vstv %s752_s22  ;;  %s779_s9 = sld [smem:[#allocation8 + $0x8]]  ;;  %v209_v22 = vmul.f32 %v208_v10, %v756_v0  ;;  %v224_v24 = vstv %s754_s23 }
  0x43   :  { %v170_v11 = vstv %s102_s24  ;;  %v178_v12 = vstv %s475_s25  ;;  %s781_s1 = sld [smem:[#allocation7 + $0xb]]  ;;  %s785_s10 = sld [smem:[#allocation7 + $0xc]]  ;;  %v217_v26 = vmul.f32 %v216_v14, %v756_v0  ;;  %v225_v30 = vmul.f32 %v224_v24, %v756_v0 }
  0x44   :  { %v171_v15 = vadd.f32 %v170_v11, %v169_v5  ;;  %v179_v16 = vadd.f32 %v178_v12, %v177_v6  ;;  %v186_v17 = vstv %s476_s26  ;;  %v194_v18 = vstv %s477_s27  ;;  %s787_s11 = sld [smem:[#allocation8 + $0x9]]  ;;  %s791_s12 = sld [smem:[#allocation7 + $0xd]] }
  0x45   :  { %v187_v19 = vadd.f32 %v186_v17, %v185_v8  ;;  %v195_v20 = vadd.f32 %v194_v18, %v193_v9  ;;  %v202_v21 = vstv %s758_s2  ;;  %v210_v23 = vstv %s760_s28  ;;  %s793_s13 = sld [smem:[#allocation8 + $0xa]]  ;;  %s799_s14 = sld [smem:[#allocation7 + $0xe]] }
  0x46   :  { %542 = vtanh.f32 %v171_v15  ;;  %v203_v25 = vadd.f32 %v202_v21, %v201_v13  ;;  %v218_v27 = vstv %s764_s30  ;;  %v232_v28 = vstv %s762_s29  ;;  %s801_s15 = sld [smem:[#allocation8 + $0xb]]  ;;  %s805_s16 = sld [smem:[#allocation8 + $0xc]] }
  0x47   :  { %544 = vtanh.f32 %v179_v16  ;;  %v211_v29 = vadd.f32 %v210_v23, %v209_v22  ;;  %v226_v31 = vstv %s772_s7  ;;  %v240_v32 = vstv %s770_s6  ;;  %s809_s0 = sld [smem:[#allocation7 + $0xf]]  ;;  %s811_s3 = sld [smem:[#allocation8 + $0xd]] }
  0x48   :  { %546 = vtanh.f32 %v187_v19  ;;  %v219_v33 = vadd.f32 %v218_v27, %v217_v26  ;;  %v233_v34 = vmul.f32 %v232_v28, %v756_v0  ;;  %v248_v35 = vstv %s775_s8  ;;  %s814_s17 = sld [smem:[#allocation10]]  ;;  %s816_s18 = sld [smem:[#allocation10 + $0x1]] }
  0x49   :  { %548 = vtanh.f32 %v195_v20  ;;  %v234_v36 = vstv %s779_s9  ;;  %v227_v37 = vadd.f32 %v226_v31, %v225_v30  ;;  %v241_v38 = vmul.f32 %v240_v32, %v756_v0  ;;  %s819_s19 = sld [smem:[#allocation10 + $0x2]]  ;;  %s821_s20 = sld [smem:[#allocation10 + $0x3]] }
  0x4a   :  { %550 = vtanh.f32 %v203_v25  ;;  %v242_v39 = vstv %s787_s11  ;;  %v249_v40 = vmul.f32 %v248_v35, %v756_v0  ;;  %v256_v41 = vstv %s781_s1  ;;  %s827_s21 = sld [smem:[#allocation10 + $0x4]]  ;;  %s829_s22 = sld [smem:[#allocation10 + $0x5]] }
  0x4b   :  { %552 = vtanh.f32 %v211_v29  ;;  %v264_v42 = vstv %s785_s10  ;;  %v235_v43 = vadd.f32 %v234_v36, %v233_v34  ;;  %v250_v44 = vstv %s793_s13  ;;  %s833_s23 = sld [smem:[#allocation7 + $0x10]]  ;;  %s835_s24 = sld [smem:[#allocation8 + $0xe]] }
  0x4c   :  { %554 = vtanh.f32 %v219_v33  ;;  %v272_v45 = vstv %s791_s12  ;;  %s837_s25 = sld [smem:[#allocation10 + $0x6]]  ;;  %v243_v48 = vadd.f32 %v242_v39, %v241_v38  ;;  %v257_v49 = vmul.f32 %v256_v41, %v756_v0  ;;  %s841_s26 = sld [smem:[#allocation7 + $0x11]] }
  0x4d   :  { %556 = vtanh.f32 %v227_v37  ;;  %v265_v50 = vmul.f32 %v264_v42, %v756_v0  ;;  %s843_s27 = sld [smem:[#allocation8 + $0xf]]  ;;  %v251_v52 = vadd.f32 %v250_v44, %v249_v40  ;;  %v258_v53 = vstv %s801_s15  ;;  %s853_s28 = sld [smem:[#allocation7 + $0x12]] }
  0x4e   :  { %v273_v54 = vmul.f32 %v272_v45, %v756_v0  ;;  %v280_v55 = vstv %s799_s14  ;;  %s848_s2 = sld [smem:[#allocation10 + $0x7]]  ;;  %v173_v57 = vstv %s814_s17  ;;  %v181_v58 = vstv %s816_s18  ;;  %s855_s29 = sld [smem:[#allocation8 + $0x10]] }
  0x4f   :  { %558 = vtanh.f32 %v235_v43  ;;  %v266_v59 = vstv %s805_s16  ;;  %v189_v62 = vstv %s819_s19  ;;  %v197_v63 = vstv %s821_s20  ;;  %s859_s30 = sld [smem:[#allocation10 + $0x8]]  ;;  %s862_s6 = sld [smem:[#allocation7 + $0x13]] }
  0x50   :  { %v543_v46 = vpop.eup %542  ;;  %v205_v3 = vstv %s827_s21  ;;  %560 = vtanh.f32 %v243_v48  ;;  %v259_v4 = vadd.f32 %v258_v53, %v257_v49  ;;  %s864_s7 = sld [smem:[#allocation8 + $0x11]]  ;;  %v274_v7 = vstv %s811_s3  ;;  %s872_s9 = sld [smem:[#allocation7 + $0x14]] }
  0x51   :  { %v545_v47 = vpop.eup %544  ;;  %v174_v60 = vmul.f32 %v543_v46, %v173_v57  ;;  %v288_v8 = vstv %s809_s0  ;;  %s868_s8 = sld [smem:[#allocation10 + $0x9]]  ;;  %v213_v10 = vstv %s829_s22  ;;  %562 = vtanh.f32 %v251_v52  ;;  %s874_s1 = sld [smem:[#allocation8 + $0x12]] }
  0x52   :  { %v547_v51 = vpop.eup %546  ;;  %v182_v61 = vmul.f32 %v545_v47, %v181_v58  ;;  %v267_v11 = vadd.f32 %v266_v59, %v265_v50  ;;  %v281_v12 = vmul.f32 %v280_v55, %v756_v0  ;;  %v282_v15 = vstv %s835_s24  ;;  %s878_s10 = sld [smem:[#allocation10 + $0xa]]  ;;  %s882_s11 = sld [smem:[#allocation7 + $0x15]] }
  0x53   :  { %v549_v56 = vpop.eup %548  ;;  %v190_v2 = vmul.f32 %v547_v51, %v189_v62  ;;  %v296_v16 = vstv %s833_s23  ;;  %v221_v18 = vstv %s837_s25  ;;  %564 = vtanh.f32 %v259_v4  ;;  %s884_s12 = sld [smem:[#allocation8 + $0x13]]  ;;  %s892_s14 = sld [smem:[#allocation7 + $0x16]] }
  0x54   :  { %v551_v1 = vpop.eup %550  ;;  %v183_v5 = vadd.f32 %v182_v61, %v174_v60  ;;  %v198_v6 = vmul.f32 %v549_v56, %v197_v63  ;;  %v275_v19 = vadd.f32 %v274_v7, %v273_v54  ;;  %v289_v20 = vmul.f32 %v288_v8, %v756_v0  ;;  %s888_s13 = sld [smem:[#allocation10 + $0xb]]  ;;  %s894_s15 = sld [smem:[#allocation8 + $0x14]] }
  0x55   :  { %v553_v9 = vpop.eup %552  ;;  %v206_v14 = vmul.f32 %v551_v1, %v205_v3  ;;  %v290_v23 = vstv %s843_s27  ;;  %v304_v24 = vstv %s841_s26  ;;  %v229_v26 = vstv %s848_s2  ;;  %s898_s16 = sld [smem:[#allocation10 + $0xc]]  ;;  %s902_s0 = sld [smem:[#allocation7 + $0x17]] }
  0x56   :  { %v191_v13 = vadd.f32 %v190_v2, %v183_v5  ;;  %v555_v17 = vpop.eup %554  ;;  %v214_v22 = vmul.f32 %v553_v9, %v213_v10  ;;  %566 = vtanh.f32 %v267_v11  ;;  %v283_v27 = vadd.f32 %v282_v15, %v281_v12  ;;  %s904_s3 = sld [smem:[#allocation8 + $0x15]]  ;;  %s912_s18 = sld [smem:[#allocation7 + $0x18]] }
  0x57   :  { %v557_v25 = vpop.eup %556  ;;  %v297_v28 = vmul.f32 %v296_v16, %v756_v0  ;;  %v222_v30 = vmul.f32 %v555_v17, %v221_v18  ;;  %v298_v31 = vstv %s855_s29  ;;  %v312_v32 = vstv %s853_s28  ;;  %s908_s17 = sld [smem:[#allocation10 + $0xd]]  ;;  %s914_s19 = sld [smem:[#allocation8 + $0x16]] }
  0x58   :  { %v199_v21 = vadd.f32 %v198_v6, %v191_v13  ;;  %v237_v34 = vstv %s859_s30  ;;  %568 = vtanh.f32 %v275_v19  ;;  %v291_v35 = vadd.f32 %v290_v23, %v289_v20  ;;  %s918_s20 = sld [smem:[#allocation10 + $0xe]]  ;;  %s922_s21 = sld [smem:[#allocation7 + $0x19]] }
  0x59   :  { %v559_v33 = vpop.eup %558  ;;  %v305_v36 = vmul.f32 %v304_v24, %v756_v0  ;;  %v230_v38 = vmul.f32 %v557_v25, %v229_v26  ;;  %v306_v39 = vstv %s864_s7  ;;  %v320_v40 = vstv %s862_s6  ;;  %s924_s22 = sld [smem:[#allocation8 + $0x17]]  ;;  %s932_s24 = sld [smem:[#allocation7 + $0x1a]] }
  0x5a   :  { %v207_v29 = vadd.f32 %v206_v14, %v199_v21  ;;  %v561_v41 = vpop.eup %560  ;;  %v245_v42 = vstv %s868_s8  ;;  %570 = vtanh.f32 %v283_v27  ;;  %v299_v43 = vadd.f32 %v298_v31, %v297_v28  ;;  %s928_s23 = sld [smem:[#allocation10 + $0xf]]  ;;  %s934_s25 = sld [smem:[#allocation8 + $0x18]] }
  0x5b   :  { %v313_v44 = vmul.f32 %v312_v32, %v756_v0  ;;  %v238_v46 = vmul.f32 %v559_v33, %v237_v34  ;;  %v314_v47 = vstv %s874_s1  ;;  %v328_v48 = vstv %s872_s9  ;;  %v563_v49 = vpop.eup %562  ;;  %s938_s26 = sld [smem:[#allocation10 + $0x10]]  ;;  %s942_s27 = sld [smem:[#allocation7 + $0x1b]] }
  0x5c   :  { %v215_v37 = vadd.f32 %v214_v22, %v207_v29  ;;  %v253_v50 = vstv %s878_s10  ;;  %572 = vtanh.f32 %v291_v35  ;;  %v307_v51 = vadd.f32 %v306_v39, %v305_v36  ;;  %s944_s2 = sld [smem:[#allocation8 + $0x19]]  ;;  %s952_s29 = sld [smem:[#allocation7 + $0x1c]] }
  0x5d   :  { %v321_v52 = vmul.f32 %v320_v40, %v756_v0  ;;  %v246_v54 = vmul.f32 %v561_v41, %v245_v42  ;;  %v322_v55 = vstv %s884_s12  ;;  %v336_v56 = vstv %s882_s11  ;;  %v565_v57 = vpop.eup %564  ;;  %s948_s28 = sld [smem:[#allocation10 + $0x11]]  ;;  %s954_s30 = sld [smem:[#allocation8 + $0x1a]] }
  0x5e   :  { %v223_v45 = vadd.f32 %v222_v30, %v215_v37  ;;  %v261_v58 = vstv %s888_s13  ;;  %574 = vtanh.f32 %v299_v43  ;;  %v315_v59 = vadd.f32 %v314_v47, %v313_v44  ;;  %s958_s6 = sld [smem:[#allocation10 + $0x12]]  ;;  %s962_s7 = sld [smem:[#allocation7 + $0x1d]] }
  0x5f   :  { %v329_v60 = vmul.f32 %v328_v48, %v756_v0  ;;  %v254_v62 = vmul.f32 %v563_v49, %v253_v50  ;;  %v330_v63 = vstv %s894_s15  ;;  %v344_v1 = vstv %s892_s14  ;;  %s964_s8 = sld [smem:[#allocation8 + $0x1b]]  ;;  %s972_s1 = sld [smem:[#allocation7 + $0x1e]] }
  0x60   :  { %v231_v53 = vadd.f32 %v230_v38, %v223_v45  ;;  %v567_v2 = vpop.eup %566  ;;  %v269_v3 = vstv %s898_s16  ;;  %576 = vtanh.f32 %v307_v51  ;;  %v323_v4 = vadd.f32 %v322_v55, %v321_v52  ;;  %s968_s9 = sld [smem:[#allocation10 + $0x13]]  ;;  %s974_s10 = sld [smem:[#allocation8 + $0x1c]] }
  0x61   :  { %v337_v5 = vmul.f32 %v336_v56, %v756_v0  ;;  %v262_v7 = vmul.f32 %v565_v57, %v261_v58  ;;  %v338_v8 = vstv %s904_s3  ;;  %v352_v9 = vstv %s902_s0  ;;  %s978_s11 = sld [smem:[#allocation10 + $0x14]]  ;;  %s982_s12 = sld [smem:[#allocation7 + $0x1f]] }
  0x62   :  { %v239_v61 = vadd.f32 %v238_v46, %v231_v53  ;;  %v569_v10 = vpop.eup %568  ;;  %v277_v11 = vstv %s908_s17  ;;  %578 = vtanh.f32 %v315_v59  ;;  %v331_v12 = vadd.f32 %v330_v63, %v329_v60  ;;  %s984_s13 = sld [smem:[#allocation8 + $0x1d]]  ;;  %s992_s15 = sld [smem:[#allocation8 + $0x1e]] }
  0x63   :  { %v345_v13 = vmul.f32 %v344_v1, %v756_v0  ;;  %v270_v15 = vmul.f32 %v567_v2, %v269_v3  ;;  %v346_v16 = vstv %s914_s19  ;;  %v360_v17 = vstv %s912_s18  ;;  %s988_s14 = sld [smem:[#allocation10 + $0x15]]  ;;  %s996_s16 = sld [smem:[#allocation10 + $0x16]] }
  0x64   :  { %v247_v6 = vadd.f32 %v246_v54, %v239_v61  ;;  %v571_v18 = vpop.eup %570  ;;  %v285_v19 = vstv %s918_s20  ;;  %580 = vtanh.f32 %v323_v4  ;;  %v339_v20 = vadd.f32 %v338_v8, %v337_v5  ;;  %s1000_s0 = sld [smem:[#allocation8 + $0x1f]]  ;;  %s1010_s17 = sld [smem:[#allocation10 + $0x18]] }
  0x65   :  { %v353_v21 = vmul.f32 %v352_v9, %v756_v0  ;;  %v278_v23 = vmul.f32 %v569_v10, %v277_v11  ;;  %v354_v24 = vstv %s924_s22  ;;  %v368_v25 = vstv %s922_s21  ;;  %s1004_s3 = sld [smem:[#allocation10 + $0x17]]  ;;  %s1016_s18 = sld [smem:[#allocation10 + $0x19]] }
  0x66   :  { %v255_v14 = vadd.f32 %v254_v62, %v247_v6  ;;  %v573_v26 = vpop.eup %572  ;;  %v293_v27 = vstv %s928_s23  ;;  %582 = vtanh.f32 %v331_v12  ;;  %v347_v28 = vadd.f32 %v346_v16, %v345_v13  ;;  %s1021_s19 = sld [smem:[#allocation10 + $0x1a]]  ;;  %s1026_s20 = sld [smem:[#allocation10 + $0x1b]] }
  0x67   :  { %v361_v29 = vmul.f32 %v360_v17, %v756_v0  ;;  %v286_v31 = vmul.f32 %v571_v18, %v285_v19  ;;  %v362_v32 = vstv %s934_s25  ;;  %v376_v33 = vstv %s932_s24  ;;  %s533_s21 = sld [smem:[#allocation10 + $0x1c]]  ;;  %s534_s22 = sld [smem:[#allocation10 + $0x1d]] }
  0x68   :  { %v263_v22 = vadd.f32 %v262_v7, %v255_v14  ;;  %v575_v34 = vpop.eup %574  ;;  %v301_v35 = vstv %s938_s26  ;;  %584 = vtanh.f32 %v339_v20  ;;  %v355_v36 = vadd.f32 %v354_v24, %v353_v21  ;;  %s535_s23 = sld [smem:[#allocation10 + $0x1e]]  ;;  %s536_s24 = sld [smem:[#allocation10 + $0x1f]] }
  0x69   :  { %v369_v37 = vmul.f32 %v368_v25, %v756_v0  ;;  %v294_v39 = vmul.f32 %v573_v26, %v293_v27  ;;  %v370_v40 = vstv %s944_s2  ;;  %v384_v41 = vstv %s942_s27  ;;  %s698_s27 = smov [#allocation11]  }
  0x6a   :  { %v271_v30 = vadd.f32 %v270_v15, %v263_v22  ;;  %v577_v42 = vpop.eup %576  ;;  %v309_v43 = vstv %s948_s28  ;;  %586 = vtanh.f32 %v347_v28  ;;  %v363_v44 = vadd.f32 %v362_v32, %v361_v29  ;;  %s433_s2 = sshll.u32 %s698_s27, 4  ;;  %s434_s2 = int_to_ptr.vmem [resolvable:$true] %s433_s2 }
  0x6b   :  { %v377_v45 = vmul.f32 %v376_v33, %v756_v0  ;;  %v302_v47 = vmul.f32 %v575_v34, %v301_v35  ;;  %v378_v48 = vstv %s954_s30  ;;  %v392_v49 = vstv %s952_s29  ;;  %s664_s28 = scalar_lea.vmem %s434_s2, 128  ;;  %p669_p10 = scmp.lt.s32.totalorder %s434_s2, %s434_s2 }
  0x6c   :  { %v279_v38 = vadd.f32 %v278_v23, %v271_v30  ;;  %v579_v50 = vpop.eup %578  ;;  %v317_v51 = vstv %s958_s6  ;;  %588 = vtanh.f32 %v355_v36  ;;  %v371_v52 = vadd.f32 %v370_v40, %v369_v37  ;;  %p665_p9 = scmp.ne.s32.totalorder %s434_s2, %s664_s28  ;;  %p670_p11 = scmp.lt.s32.totalorder %s664_s28, %s664_s28 }
  0x6d   :  { %v385_v53 = vmul.f32 %v384_v41, %v756_v0  ;;  %v310_v55 = vmul.f32 %v577_v42, %v309_v43  ;;  %v386_v56 = vstv %s964_s8  ;;  %v400_v57 = vstv %s962_s7 }
  0x6e   :  { %v287_v46 = vadd.f32 %v286_v31, %v279_v38  ;;  %v581_v58 = vpop.eup %580  ;;  %v325_v59 = vstv %s968_s9  ;;  %590 = vtanh.f32 %v363_v44  ;;  %v379_v60 = vadd.f32 %v378_v48, %v377_v45  ;;  %p671_p12 = por %p670_p11, %p669_p10 }
  0x6f   :  { %v393_v61 = vmul.f32 %v392_v49, %v756_v0  ;;  %v318_v63 = vmul.f32 %v579_v50, %v317_v51  ;;  %v394_v1 = vstv %s974_s10  ;;  %v408_v2 = vstv %s972_s1 }
  0x70   :  { %v295_v54 = vadd.f32 %v294_v39, %v287_v46  ;;  %v583_v3 = vpop.eup %582  ;;  %v333_v4 = vstv %s978_s11  ;;  %592 = vtanh.f32 %v371_v52  ;;  %v387_v5 = vadd.f32 %v386_v56, %v385_v53  ;;  %p672_p13 = pnand %p671_p12, %p665_p9 }
  0x71   :  { %v401_v6 = vmul.f32 %v400_v57, %v756_v0  ;;  %v326_v8 = vmul.f32 %v581_v58, %v325_v59  ;;  %v402_v9 = vstv %s984_s13  ;;  %v416_v10 = vstv %s982_s12 }
  0x72   :  { %v303_v62 = vadd.f32 %v302_v47, %v295_v54  ;;  %v585_v11 = vpop.eup %584  ;;  %v341_v12 = vstv %s988_s14  ;;  %594 = vtanh.f32 %v379_v60  ;;  %v395_v13 = vadd.f32 %v394_v1, %v393_v61 }
  0x73   :  { %v409_v14 = vmul.f32 %v408_v2, %v756_v0  ;;  %v334_v16 = vmul.f32 %v583_v3, %v333_v4  ;;  %v410_v17 = vstv %s992_s15  ;;  %v349_v19 = vstv %s996_s16 }
  0x74   :  { %v311_v7 = vadd.f32 %v310_v55, %v303_v62  ;;  %v587_v18 = vpop.eup %586  ;;  %596 = vtanh.f32 %v387_v5  ;;  %v403_v20 = vadd.f32 %v402_v9, %v401_v6  ;;  %v417_v21 = vmul.f32 %v416_v10, %v756_v0 }
  0x75   :  { %v342_v23 = vmul.f32 %v585_v11, %v341_v12  ;;  %v418_v24 = vstv %s1000_s0  ;;  %v357_v26 = vstv %s1004_s3  ;;  %598 = vtanh.f32 %v395_v13 }
  0x76   :  { %v319_v15 = vadd.f32 %v318_v63, %v311_v7  ;;  %v589_v25 = vpop.eup %588  ;;  %v411_v27 = vadd.f32 %v410_v17, %v409_v14  ;;  %v350_v29 = vmul.f32 %v587_v18, %v349_v19  ;;  %v365_v31 = vstv %s1010_s17 }
  0x77   :  { %600 = vtanh.f32 %v403_v20  ;;  %v419_v32 = vadd.f32 %v418_v24, %v417_v21  ;;  %v358_v0 = vmul.f32 %v589_v25, %v357_v26  ;;  %v373_v35 = vstv %s1016_s18 }
  0x78   :  { %v327_v22 = vadd.f32 %v326_v8, %v319_v15  ;;  %v591_v30 = vpop.eup %590  ;;  %602 = vtanh.f32 %v411_v27  ;;  %v381_v39 = vstv %s1021_s19  ;;  %v389_v43 = vstv %s1026_s20 }
  0x79   :  { %v366_v37 = vmul.f32 %v591_v30, %v365_v31  ;;  %604 = vtanh.f32 %v419_v32  ;;  %v397_v47 = vstv %s533_s21  ;;  %v405_v51 = vstv %s534_s22 }
  0x7a   :  { %v335_v28 = vadd.f32 %v334_v16, %v327_v22  ;;  %v593_v34 = vpop.eup %592  ;;  %v413_v55 = vstv %s535_s23  ;;  %v421_v59 = vstv %s536_s24  ;;  %v424_v2 = vstv %s1052_s4 }
  0x7b   :  { %v374_v41 = vmul.f32 %v593_v34, %v373_v35 }
  0x7c   :  { %v343_v33 = vadd.f32 %v342_v23, %v335_v28  ;;  %v595_v38 = vpop.eup %594 }
  0x7d   :  { %v382_v45 = vmul.f32 %v595_v38, %v381_v39 }
  0x7e   :  { %v351_v36 = vadd.f32 %v350_v29, %v343_v33  ;;  %v597_v42 = vpop.eup %596 }
  0x7f   :  { %v599_v46 = vpop.eup %598  ;;  %v390_v49 = vmul.f32 %v597_v42, %v389_v43 }
  0x80   :  { %v359_v40 = vadd.f32 %v358_v0, %v351_v36  ;;  %v398_v53 = vmul.f32 %v599_v46, %v397_v47 }
  0x81   :  { %v601_v50 = vpop.eup %600 }
  0x82   :  { %v367_v44 = vadd.f32 %v366_v37, %v359_v40  ;;  %v603_v54 = vpop.eup %602  ;;  %v406_v57 = vmul.f32 %v601_v50, %v405_v51 }
  0x83   :  { %v605_v58 = vpop.eup %604  ;;  %v414_v61 = vmul.f32 %v603_v54, %v413_v55 }
  0x84   :  { %v375_v48 = vadd.f32 %v374_v41, %v367_v44  ;;  %v422_v63 = vmul.f32 %v605_v58, %v421_v59 }
  0x86   :  { %v383_v52 = vadd.f32 %v382_v45, %v375_v48 }
  0x88   :  { %v391_v56 = vadd.f32 %v390_v49, %v383_v52 }
  0x8a   :  { %v399_v60 = vadd.f32 %v398_v53, %v391_v56 }
  0x8c   :  { %v407_v62 = vadd.f32 %v406_v57, %v399_v60 }
  0x8e   :  { %v415_v1 = vadd.f32 %v414_v61, %v407_v62 }
  0x90   :  { %v423_v3 = vadd.f32 %v422_v63, %v415_v1 }
  0x92   :  { %v425_v4 = vadd.f32 %v424_v2, %v423_v3 }
  0x94   :  { %426 = vst [vmem:[#allocation11] sm:$0xff] %v425_v4 }
  0x95   :  { %675 = shalt.err (!%p672_p13)
}
  0x96   :  { %s676_s6 = scalar_lea.hbm %s1053_s5, 128 }
  0x97   :  { %p677_p0 = scmp.ne.s32.totalorder %s1053_s5, %s676_s6  ;;  %p680_p1 = scmp.lt.u32.totalorder %s676_s6, %s1053_s5 }
  0x99   :  { %p682_p2 = pnand %p680_p1, %p677_p0 }
  0x9b   :  { %685 = shalt.err (!%p682_p2)
}
  0x9c   :  { %436 = dma.vmem_to_hbm [thread:$0]  %s434_s2, 128, %s1053_s5, [#allocation5]  }
  0x9d   :  { %692 = dma.done.wait [#allocation5], 128  }
  0x9e   :  { %693 = vsyncadd [#allocation5], 4294967168 }
  0x9f   :  { %440 = vsyncpa [#allocation4], 1 }
  0xa0   :  { %441 = vsyncpa [#allocation5], 1 }
  0xa1   :  { %442 = vsyncpa [#allocation6], 1 }
  0xa2   :  { %443 = vsyncpa [#allocation9], 1 }

</bundles_post_ra>
